<compile_context>
chip_gen: v5e
topology: v5e:2x2
jax: 0.10.0
libtpu: 0.0.40
codegen_flags: <defaults>
</compile_context>

<pallas_src>
import functools

import jax
import jax.numpy as jnp
from jax.experimental import pallas as pl
from jax.experimental.pallas import tpu as pltpu


def _diffusion_kernel(ah_ref, xz_ref, w_ref, sse_ref, *, B, TN, D, H):
    """One invocation over the whole batch (channels-first, lane-dense).

    ah_ref  : (B,)               SMEM  alpha_hat[t] per batch element
    xz_ref  : (2*D, B*TN)        VMEM  rows [0:D] = x_0, rows [D:2D] = noise
    w_ref   : (H, H + 1 + D + B) VMEM  [:D,:H]=w2^T | [:D,H]=b2 |
                                       [:,H+1:H+1+D]=w1^T | [:,H+1+D:]=temb(+b1)
    sse_ref : (2,)               SMEM  [0] = noise SSE, [1] = player SSE
    """
    w2t = w_ref[0:D, 0:H]                        # (D, H)
    b2 = w_ref[0:D, H:H + 1]                     # (D, 1)
    w1t = w_ref[:, H + 1:H + 1 + D]              # (H, D)
    temb = w_ref[:, H + 1 + D:H + 1 + D + B]     # (H, B)  (b1 folded in)

    sse_n = jnp.zeros((), jnp.float32)
    sse_p = jnp.zeros((), jnp.float32)

    for b in range(B):                           # B is tiny & static -> unrolled
        lo, hi = b * TN, (b + 1) * TN
        x0 = xz_ref[0:D, lo:hi]                  # (D, TN)
        nz = xz_ref[D:2 * D, lo:hi]              # (D, TN)

        # schedule scalars: SMEM scalar -> lane broadcast -> sqrt on the idle EUP
        ah = jnp.broadcast_to(ah_ref[b], (1, TN)).astype(jnp.float32)
        sa = jnp.sqrt(ah)                        # (1, TN) sqrt(alpha_hat)
        som = jnp.sqrt(1.0 - ah)                 # (1, TN) sqrt(1 - alpha_hat)

        # ---- q_sample ----
        x_t = sa * x0 + som * nz                 # (D, TN)

        # ---- inner model (time-conditioned channel-mixing MLP / 1x1 conv) ----
        # first layer (K = D = 4): VPU broadcast-FMAs instead of a near-empty MXU
        h = jnp.broadcast_to(temb[:, b:b + 1], (H, TN))
        for d in range(D):
            h = h + w1t[:, d:d + 1] * x_t[d:d + 1, :]
        h = jnp.maximum(h, 0.0)                  # ReLU
        # second layer (K = H = 32): MXU, pinned f32 precision to match reference
        pred = jnp.dot(w2t, h,
                       precision=jax.lax.Precision.HIGHEST,
                       preferred_element_type=jnp.float32)    # (D, TN)
        pred = pred + b2

        # ---- losses (sum of squared error; means taken in the wrapper) ----
        dn = pred - nz
        x0_pred = (x_t - som * pred) / sa        # exact divide (matches reference)
        dp = x0_pred - x0
        sse_n = sse_n + jnp.sum(dn * dn)
        sse_p = sse_p + jnp.sum(dp * dp)

    sse_ref[0] = sse_n
    sse_ref[1] = sse_p


@jax.jit
def diffusion_forward(x_0, t, noise, alpha_hat, params):
    """Returns (noise_loss, player_loss) matching DiffusionTrajectoryModel.forward."""
    B, T, N, D = x_0.shape
    TN = T * N
    BTN = B * TN                                 # 256 here -> lane-dense multiple of 128
    H = params["w1"].shape[1]

    # data slab: channels-first, lane-dense (2*D, B*TN); column c = b*TN + p
    x0_cf = jnp.transpose(x_0.reshape(B, TN, D), (2, 0, 1)).reshape(D, BTN)
    nz_cf = jnp.transpose(noise.reshape(B, TN, D), (2, 0, 1)).reshape(D, BTN)
    xz = jnp.concatenate([x0_cf, nz_cf], axis=0).astype(jnp.float32)   # (2D, BTN)

    # per-batch schedule scalars (sqrt done in-kernel)
    ah = alpha_hat[t].astype(jnp.float32)        # (B,)

    # sinusoidal time embedding (glue, deterministic); b1 folded in
    half = H // 2
    freqs = jnp.exp(-jnp.log(10000.0) * jnp.arange(half, dtype=jnp.float32) / half)
    ang = t.astype(jnp.float32)[:, None] * freqs[None, :]
    temb = jnp.concatenate([jnp.sin(ang), jnp.cos(ang)], axis=-1)      # (B, H)
    temb_col = temb.T.astype(jnp.float32) + params["b1"].reshape(H, 1).astype(jnp.float32)

    # packed weight slab (single DMA): (H, H + 1 + D + B)
    w2t_pad = jnp.zeros((H, H), jnp.float32).at[0:D, :].set(
        params["w2"].T.astype(jnp.float32))
    b2_pad = jnp.zeros((H, 1), jnp.float32).at[0:D, 0].set(
        params["b2"].reshape(D).astype(jnp.float32))
    w1t = params["w1"].T.astype(jnp.float32)                           # (H, D)
    wslab = jnp.concatenate([w2t_pad, b2_pad, w1t, temb_col], axis=1)  # (H, H+1+D+B)

    cost = pl.CostEstimate(
        flops=4 * D * H * BTN + 16 * D * BTN,
        transcendentals=2 * BTN,
        bytes_accessed=4 * (xz.size + wslab.size + ah.size) + 8,
    )

    kernel = functools.partial(_diffusion_kernel, B=B, TN=TN, D=D, H=H)
    sse = pl.pallas_call(
        kernel,
        out_shape=jax.ShapeDtypeStruct((2,), jnp.float32),
        in_specs=[
            pl.BlockSpec(memory_space=pltpu.MemorySpace.SMEM),   # ah (B,)
            pl.BlockSpec(memory_space=pltpu.MemorySpace.VMEM),   # xz (2D, BTN)
            pl.BlockSpec(memory_space=pltpu.MemorySpace.VMEM),   # wslab
        ],
        out_specs=pl.BlockSpec(memory_space=pltpu.MemorySpace.SMEM),
        cost_estimate=cost,
        # TODO(synk): if BTN scales up, add a ("parallel",) grid over the lane axis
        # (2 TCs on v7x) and set pltpu.CompilerParams(vmem_limit_bytes=...) per chip.
    )(ah, xz, wslab)

    count = jnp.float32(B * T * N * D)
    return sse[0] / count, sse[1] / count


def _reference_forward(x_0, t, noise, alpha_hat, params):
    """Pure-JAX reference mirroring the PyTorch semantics (for verification)."""
    B, T, N, D = x_0.shape
    H = params["w1"].shape[1]
    ah = alpha_hat[t].reshape(B, 1, 1, 1)
    sa = jnp.sqrt(ah)
    som = jnp.sqrt(1.0 - ah)
    x_t = sa * x_0 + som * noise                       # (B,T,N,D)
    # synthetic inner model (channel mixing over D == 1x1 conv in NCHW layout)
    half = H // 2
    freqs = jnp.exp(-jnp.log(10000.0) * jnp.arange(half, dtype=jnp.float32) / half)
    ang = t.astype(jnp.float32)[:, None] * freqs[None, :]
    temb = jnp.concatenate([jnp.sin(ang), jnp.cos(ang)], axis=-1)   # (B,H)
    h = jnp.einsum("btnd,dh->btnh", x_t, params["w1"],
                   precision=jax.lax.Precision.HIGHEST) \
        + params["b1"][0] + temb[:, None, None, :]
    h = jnp.maximum(h, 0.0)
    pred = jnp.einsum("btnh,hd->btnd", h, params["w2"],
                      precision=jax.lax.Precision.HIGHEST) + params["b2"][0]
    noise_loss = jnp.mean((pred - noise) ** 2)
    x0_pred = (x_t - som * pred) / sa
    player_loss = jnp.mean((x0_pred - x_0) ** 2, axis=(1, 3)).mean()
    return noise_loss, player_loss


if __name__ == "__main__":
    key = jax.random.PRNGKey(0)
    B, T, N, D, H = 2, 16, 8, 4, 32
    num_steps = 1000

    # diffusion schedule (betas -> alphas -> alpha_hat), matching __init__
    betas = jnp.linspace(1e-4, 0.02, num_steps, dtype=jnp.float32)
    alphas = 1.0 - betas
    alpha_hat = jnp.cumprod(alphas)

    k1, k2, k3, k4, k5 = jax.random.split(key, 5)
    x_0 = jax.random.normal(k1, (B, T, N, D), dtype=jnp.float32)
    t = jax.random.randint(k2, (B,), 0, num_steps)       # torch.randint(0, num_steps, (B,))
    noise = jax.random.normal(k3, (B, T, N, D), dtype=jnp.float32)

    params = {
        "w1": 0.1 * jax.random.normal(k4, (D, H), dtype=jnp.float32),
        "b1": jnp.zeros((1, H), jnp.float32),
        "w2": 0.1 * jax.random.normal(k5, (H, D), dtype=jnp.float32),
        "b2": jnp.zeros((1, D), jnp.float32),
    }

    noise_loss, player_loss = diffusion_forward(x_0, t, noise, alpha_hat, params)
    jax.block_until_ready((noise_loss, player_loss))

    ref_noise, ref_player = _reference_forward(x_0, t, noise, alpha_hat, params)
    assert jnp.allclose(noise_loss, ref_noise, rtol=1e-4, atol=1e-5), (noise_loss, ref_noise)
    assert jnp.allclose(player_loss, ref_player, rtol=1e-4, atol=1e-5), (player_loss, ref_player)

    print("KERNEL_OK")
</pallas_src>

<mosaic_0001>
module attributes {stable_mosaic.version = 11 : i64} {
  func.func @_diffusion_kernel(%arg0: memref<2xf32, #tpu.memory_space<smem>>, %arg1: memref<8x256xf32, #tpu.memory_space<vmem>>, %arg2: memref<32x39xf32, #tpu.memory_space<vmem>>, %arg3: memref<2xf32, #tpu.memory_space<smem>>) attributes {dimension_semantics = [], scalar_prefetch = 0 : i64, scratch_operands = 0 : i64, tpu.core_type = #tpu.core_type<tc>} {
    %c0 = arith.constant 0 : index
    %c0_0 = arith.constant 0 : index
    %0 = vector.load %arg2[%c0, %c0_0] : memref<32x39xf32, #tpu.memory_space<vmem>>, vector<4x32xf32>
    %c0_1 = arith.constant 0 : index
    %c32 = arith.constant 32 : index
    %1 = vector.load %arg2[%c0_1, %c32] : memref<32x39xf32, #tpu.memory_space<vmem>>, vector<4x1xf32>
    %c0_2 = arith.constant 0 : index
    %c33 = arith.constant 33 : index
    %2 = vector.load %arg2[%c0_2, %c33] : memref<32x39xf32, #tpu.memory_space<vmem>>, vector<32x4xf32>
    %c0_3 = arith.constant 0 : index
    %c37 = arith.constant 37 : index
    %3 = vector.load %arg2[%c0_3, %c37] : memref<32x39xf32, #tpu.memory_space<vmem>>, vector<32x2xf32>
    %c0_4 = arith.constant 0 : index
    %c0_5 = arith.constant 0 : index
    %4 = vector.load %arg1[%c0_4, %c0_5] : memref<8x256xf32, #tpu.memory_space<vmem>>, vector<4x128xf32>
    %c4 = arith.constant 4 : index
    %c0_6 = arith.constant 0 : index
    %5 = vector.load %arg1[%c4, %c0_6] : memref<8x256xf32, #tpu.memory_space<vmem>>, vector<4x128xf32>
    %c0_7 = arith.constant 0 : index
    %6 = memref.load %arg0[%c0_7] : memref<2xf32, #tpu.memory_space<smem>>
    %7 = vector.broadcast %6 : f32 to vector<1x128xf32>
    %8 = math.sqrt %7 : vector<1x128xf32>
    %cst = arith.constant 1.000000e+00 : f32
    %9 = vector.broadcast %cst : f32 to vector<1x128xf32>
    %10 = arith.subf %9, %7 : vector<1x128xf32>
    %11 = math.sqrt %10 : vector<1x128xf32>
    %12 = vector.broadcast %8 : vector<1x128xf32> to vector<4x128xf32>
    %13 = arith.mulf %12, %4 : vector<4x128xf32>
    %14 = vector.broadcast %11 : vector<1x128xf32> to vector<4x128xf32>
    %15 = arith.mulf %14, %5 : vector<4x128xf32>
    %16 = arith.addf %13, %15 : vector<4x128xf32>
    %17 = vector.extract_strided_slice %3 {offsets = [0, 0], sizes = [32, 1], strides = [1, 1]} : vector<32x2xf32> to vector<32x1xf32>
    %18 = vector.shape_cast %17 : vector<32x1xf32> to vector<32x1xf32>
    %19 = vector.broadcast %18 : vector<32x1xf32> to vector<32x128xf32>
    %20 = vector.extract_strided_slice %2 {offsets = [0, 0], sizes = [32, 1], strides = [1, 1]} : vector<32x4xf32> to vector<32x1xf32>
    %21 = vector.extract_strided_slice %16 {offsets = [0, 0], sizes = [1, 128], strides = [1, 1]} : vector<4x128xf32> to vector<1x128xf32>
    %22 = vector.broadcast %20 : vector<32x1xf32> to vector<32x128xf32>
    %23 = vector.broadcast %21 : vector<1x128xf32> to vector<32x128xf32>
    %24 = arith.mulf %22, %23 : vector<32x128xf32>
    %25 = arith.addf %19, %24 : vector<32x128xf32>
    %26 = vector.extract_strided_slice %2 {offsets = [0, 1], sizes = [32, 1], strides = [1, 1]} : vector<32x4xf32> to vector<32x1xf32>
    %27 = vector.extract_strided_slice %16 {offsets = [1, 0], sizes = [1, 128], strides = [1, 1]} : vector<4x128xf32> to vector<1x128xf32>
    %28 = vector.broadcast %26 : vector<32x1xf32> to vector<32x128xf32>
    %29 = vector.broadcast %27 : vector<1x128xf32> to vector<32x128xf32>
    %30 = arith.mulf %28, %29 : vector<32x128xf32>
    %31 = arith.addf %25, %30 : vector<32x128xf32>
    %32 = vector.extract_strided_slice %2 {offsets = [0, 2], sizes = [32, 1], strides = [1, 1]} : vector<32x4xf32> to vector<32x1xf32>
    %33 = vector.extract_strided_slice %16 {offsets = [2, 0], sizes = [1, 128], strides = [1, 1]} : vector<4x128xf32> to vector<1x128xf32>
    %34 = vector.broadcast %32 : vector<32x1xf32> to vector<32x128xf32>
    %35 = vector.broadcast %33 : vector<1x128xf32> to vector<32x128xf32>
    %36 = arith.mulf %34, %35 : vector<32x128xf32>
    %37 = arith.addf %31, %36 : vector<32x128xf32>
    %38 = vector.extract_strided_slice %2 {offsets = [0, 3], sizes = [32, 1], strides = [1, 1]} : vector<32x4xf32> to vector<32x1xf32>
    %39 = vector.extract_strided_slice %16 {offsets = [3, 0], sizes = [1, 128], strides = [1, 1]} : vector<4x128xf32> to vector<1x128xf32>
    %40 = vector.broadcast %38 : vector<32x1xf32> to vector<32x128xf32>
    %41 = vector.broadcast %39 : vector<1x128xf32> to vector<32x128xf32>
    %42 = arith.mulf %40, %41 : vector<32x128xf32>
    %43 = arith.addf %37, %42 : vector<32x128xf32>
    %cst_8 = arith.constant 0.000000e+00 : f32
    %44 = vector.broadcast %cst_8 : f32 to vector<32x128xf32>
    %45 = arith.maximumf %43, %44 : vector<32x128xf32>
    %cst_9 = arith.constant dense<0.000000e+00> : vector<4x128xf32>
    %46 = tpu.matmul %0, %45, %cst_9 {dimension_numbers = #tpu.dot_dimension_numbers<[1], [0], [0], [1], [0, 0, 1, 1], [], []>, precision = #tpu.contract_precision<fp32>} : vector<4x32xf32>, vector<32x128xf32>, vector<4x128xf32> -> vector<4x128xf32>
    %47 = vector.broadcast %1 : vector<4x1xf32> to vector<4x128xf32>
    %48 = arith.addf %46, %47 : vector<4x128xf32>
    %49 = arith.subf %48, %5 : vector<4x128xf32>
    %50 = vector.broadcast %11 : vector<1x128xf32> to vector<4x128xf32>
    %51 = arith.mulf %50, %48 : vector<4x128xf32>
    %52 = arith.subf %16, %51 : vector<4x128xf32>
    %53 = vector.broadcast %8 : vector<1x128xf32> to vector<4x128xf32>
    %54 = arith.divf %52, %53 : vector<4x128xf32>
    %55 = arith.subf %54, %4 : vector<4x128xf32>
    %56 = arith.mulf %49, %49 : vector<4x128xf32>
    %57 = vector.shape_cast %56 : vector<4x128xf32> to vector<1x4x128xf32>
    %cst_10 = arith.constant dense<0.000000e+00> : vector<1xf32>
    %58 = vector.multi_reduction <add>, %57, %cst_10 [1, 2] : vector<1x4x128xf32> to vector<1xf32>
    %59 = vector.shape_cast %58 : vector<1xf32> to vector<1x1x1xf32>
    %60 = vector.extract %59[0, 0, 0] : f32 from vector<1x1x1xf32>
    %cst_11 = arith.constant 0.000000e+00 : f32
    %61 = arith.addf %cst_11, %60 : f32
    %62 = arith.mulf %55, %55 : vector<4x128xf32>
    %63 = vector.shape_cast %62 : vector<4x128xf32> to vector<1x4x128xf32>
    %cst_12 = arith.constant dense<0.000000e+00> : vector<1xf32>
    %64 = vector.multi_reduction <add>, %63, %cst_12 [1, 2] : vector<1x4x128xf32> to vector<1xf32>
    %65 = vector.shape_cast %64 : vector<1xf32> to vector<1x1x1xf32>
    %66 = vector.extract %65[0, 0, 0] : f32 from vector<1x1x1xf32>
    %cst_13 = arith.constant 0.000000e+00 : f32
    %67 = arith.addf %cst_13, %66 : f32
    %c0_14 = arith.constant 0 : index
    %c128 = arith.constant 128 : index
    %68 = vector.load %arg1[%c0_14, %c128] : memref<8x256xf32, #tpu.memory_space<vmem>>, vector<4x128xf32>
    %c4_15 = arith.constant 4 : index
    %c128_16 = arith.constant 128 : index
    %69 = vector.load %arg1[%c4_15, %c128_16] : memref<8x256xf32, #tpu.memory_space<vmem>>, vector<4x128xf32>
    %c1 = arith.constant 1 : index
    %70 = memref.load %arg0[%c1] : memref<2xf32, #tpu.memory_space<smem>>
    %71 = vector.broadcast %70 : f32 to vector<1x128xf32>
    %72 = math.sqrt %71 : vector<1x128xf32>
    %cst_17 = arith.constant 1.000000e+00 : f32
    %73 = vector.broadcast %cst_17 : f32 to vector<1x128xf32>
    %74 = arith.subf %73, %71 : vector<1x128xf32>
    %75 = math.sqrt %74 : vector<1x128xf32>
    %76 = vector.broadcast %72 : vector<1x128xf32> to vector<4x128xf32>
    %77 = arith.mulf %76, %68 : vector<4x128xf32>
    %78 = vector.broadcast %75 : vector<1x128xf32> to vector<4x128xf32>
    %79 = arith.mulf %78, %69 : vector<4x128xf32>
    %80 = arith.addf %77, %79 : vector<4x128xf32>
    %81 = vector.extract_strided_slice %3 {offsets = [0, 1], sizes = [32, 1], strides = [1, 1]} : vector<32x2xf32> to vector<32x1xf32>
    %82 = vector.shape_cast %81 : vector<32x1xf32> to vector<32x1xf32>
    %83 = vector.broadcast %82 : vector<32x1xf32> to vector<32x128xf32>
    %84 = vector.extract_strided_slice %2 {offsets = [0, 0], sizes = [32, 1], strides = [1, 1]} : vector<32x4xf32> to vector<32x1xf32>
    %85 = vector.extract_strided_slice %80 {offsets = [0, 0], sizes = [1, 128], strides = [1, 1]} : vector<4x128xf32> to vector<1x128xf32>
    %86 = vector.broadcast %84 : vector<32x1xf32> to vector<32x128xf32>
    %87 = vector.broadcast %85 : vector<1x128xf32> to vector<32x128xf32>
    %88 = arith.mulf %86, %87 : vector<32x128xf32>
    %89 = arith.addf %83, %88 : vector<32x128xf32>
    %90 = vector.extract_strided_slice %2 {offsets = [0, 1], sizes = [32, 1], strides = [1, 1]} : vector<32x4xf32> to vector<32x1xf32>
    %91 = vector.extract_strided_slice %80 {offsets = [1, 0], sizes = [1, 128], strides = [1, 1]} : vector<4x128xf32> to vector<1x128xf32>
    %92 = vector.broadcast %90 : vector<32x1xf32> to vector<32x128xf32>
    %93 = vector.broadcast %91 : vector<1x128xf32> to vector<32x128xf32>
    %94 = arith.mulf %92, %93 : vector<32x128xf32>
    %95 = arith.addf %89, %94 : vector<32x128xf32>
    %96 = vector.extract_strided_slice %2 {offsets = [0, 2], sizes = [32, 1], strides = [1, 1]} : vector<32x4xf32> to vector<32x1xf32>
    %97 = vector.extract_strided_slice %80 {offsets = [2, 0], sizes = [1, 128], strides = [1, 1]} : vector<4x128xf32> to vector<1x128xf32>
    %98 = vector.broadcast %96 : vector<32x1xf32> to vector<32x128xf32>
    %99 = vector.broadcast %97 : vector<1x128xf32> to vector<32x128xf32>
    %100 = arith.mulf %98, %99 : vector<32x128xf32>
    %101 = arith.addf %95, %100 : vector<32x128xf32>
    %102 = vector.extract_strided_slice %2 {offsets = [0, 3], sizes = [32, 1], strides = [1, 1]} : vector<32x4xf32> to vector<32x1xf32>
    %103 = vector.extract_strided_slice %80 {offsets = [3, 0], sizes = [1, 128], strides = [1, 1]} : vector<4x128xf32> to vector<1x128xf32>
    %104 = vector.broadcast %102 : vector<32x1xf32> to vector<32x128xf32>
    %105 = vector.broadcast %103 : vector<1x128xf32> to vector<32x128xf32>
    %106 = arith.mulf %104, %105 : vector<32x128xf32>
    %107 = arith.addf %101, %106 : vector<32x128xf32>
    %cst_18 = arith.constant 0.000000e+00 : f32
    %108 = vector.broadcast %cst_18 : f32 to vector<32x128xf32>
    %109 = arith.maximumf %107, %108 : vector<32x128xf32>
    %cst_19 = arith.constant dense<0.000000e+00> : vector<4x128xf32>
    %110 = tpu.matmul %0, %109, %cst_19 {dimension_numbers = #tpu.dot_dimension_numbers<[1], [0], [0], [1], [0, 0, 1, 1], [], []>, precision = #tpu.contract_precision<fp32>} : vector<4x32xf32>, vector<32x128xf32>, vector<4x128xf32> -> vector<4x128xf32>
    %111 = vector.broadcast %1 : vector<4x1xf32> to vector<4x128xf32>
    %112 = arith.addf %110, %111 : vector<4x128xf32>
    %113 = arith.subf %112, %69 : vector<4x128xf32>
    %114 = vector.broadcast %75 : vector<1x128xf32> to vector<4x128xf32>
    %115 = arith.mulf %114, %112 : vector<4x128xf32>
    %116 = arith.subf %80, %115 : vector<4x128xf32>
    %117 = vector.broadcast %72 : vector<1x128xf32> to vector<4x128xf32>
    %118 = arith.divf %116, %117 : vector<4x128xf32>
    %119 = arith.subf %118, %68 : vector<4x128xf32>
    %120 = arith.mulf %113, %113 : vector<4x128xf32>
    %121 = vector.shape_cast %120 : vector<4x128xf32> to vector<1x4x128xf32>
    %cst_20 = arith.constant dense<0.000000e+00> : vector<1xf32>
    %122 = vector.multi_reduction <add>, %121, %cst_20 [1, 2] : vector<1x4x128xf32> to vector<1xf32>
    %123 = vector.shape_cast %122 : vector<1xf32> to vector<1x1x1xf32>
    %124 = vector.extract %123[0, 0, 0] : f32 from vector<1x1x1xf32>
    %125 = arith.addf %61, %124 : f32
    %126 = arith.mulf %119, %119 : vector<4x128xf32>
    %127 = vector.shape_cast %126 : vector<4x128xf32> to vector<1x4x128xf32>
    %cst_21 = arith.constant dense<0.000000e+00> : vector<1xf32>
    %128 = vector.multi_reduction <add>, %127, %cst_21 [1, 2] : vector<1x4x128xf32> to vector<1xf32>
    %129 = vector.shape_cast %128 : vector<1xf32> to vector<1x1x1xf32>
    %130 = vector.extract %129[0, 0, 0] : f32 from vector<1x1x1xf32>
    %131 = arith.addf %67, %130 : f32
    %c0_22 = arith.constant 0 : index
    %132 = memref.load %arg3[%c0_22] : memref<2xf32, #tpu.memory_space<smem>>
    memref.store %125, %arg3[%c0_22] : memref<2xf32, #tpu.memory_space<smem>>
    %c1_23 = arith.constant 1 : index
    %133 = memref.load %arg3[%c1_23] : memref<2xf32, #tpu.memory_space<smem>>
    memref.store %131, %arg3[%c1_23] : memref<2xf32, #tpu.memory_space<smem>>
    return
  }
}

</mosaic_0001>

<bundles_post_ra>
// kernel: diffusion_forward.1
= control target key start
LH: loop header
LB: loop body
LE: loop exit
PB: predicated region body
PF: predicated region fallthrough
CT: control target
= control target key end

     0   :  { %8 = vsyncpa [#allocation3], 0  ;;  %s1175_s0 = inlined_call_operand.vmem [shape: f32[2], index: 0, kind: input, shape index: {}]   ;;  %s1176_s1 = inlined_call_operand.vmem [shape: f32[8,256], index: 1, kind: input, shape index: {}]   ;;  %s1177_s2 = inlined_call_operand.vmem [shape: f32[32,39], index: 2, kind: input, shape index: {}]   ;;  %s1178_s3 = inlined_call_operand.vmem [shape: f32[2], index: 3, kind: output, shape index: {}]  }
   0x1   :  { %9 = vsyncpa [#allocation4], 0  ;;  %s15_s14 = sshll.u32 %s1175_s0, 4  ;;  %s853_s15 = smov [#allocation2]   ;;  %s16_s14 = int_to_ptr.vmem [resolvable:$true] %s15_s14 }
   0x2   :  { %18 = dma.vmem_to_smem %s16_s14, 16, %s853_s15, [#allocation3]  }
   0x3   :  { %849 = dma.done.wait [#allocation3], 16  }
   0x4   :  { %850 = vsyncadd [#allocation3], 4294967280 }
   0x5   :  { %27 = sfence }
   0x6   :  { %v32_v0 = vld [vmem:[%s1177_s2 + $0x18] sm:$0xff]  ;;  %v31_v1 = vld [vmem:[%s1177_s2 + $0x10] sm:$0xff]  ;;  %v854_v2 = vmov 33   ;;  %v855_v3 = vmov 37   ;;  %v30_v4 = vld [vmem:[%s1177_s2 + $0x8] sm:$0xff]  ;;  %v856_v5 = vmov 34  }
   0x7   :  { %794 = vset.pattern.permute.xlu1 %v854_v2  ;;  %792 = vset.pattern.permute.xlu0 %v854_v2  ;;  %v857_v6 = vmov 35   ;;  %v29_v7 = vld [vmem:[%s1177_s2] sm:$0xff]  ;;  %v858_v8 = vmov 36   ;;  %v859_v9 = vmov 38   ;;  %s35_s23 = sld [smem:[#allocation2]]  ;;  %vm197_vm8 = vcmask 261120  }
   0x8   :  { %796 = vset.pattern.permute.xlu2 %v855_v3  ;;  %101 = vperm.xlu0 %792, %v32_v0   ;;  %s774_s24 = sld [smem:[#allocation2 + $0x1]]  ;;  %v924_v45 = vld [vmem:[%s1176_s1] sm:$0xf0]  ;;  %v935_v54 = vld [vmem:[%s1176_s1] sm:$0xf]  ;;  %vm408_vm13 = vcmask 1043456  }
   0x9   :  { %80 = vperm.xlu2 %796, %v31_v1   ;;  %97 = vperm.xlu1 %794, %v31_v1   ;;  %s763_s12 = sshll.u32 %s1178_s3, 4  ;;  %s861_s15 = smov [#allocation5]   ;;  %s764_s12 = int_to_ptr.vmem [resolvable:$true] %s763_s12 }
   0xd   :  { %v36_v10 = vstv %s35_s23 }
   0xe   :  { %v49_v11 = vsub.f32 1.0, %v36_v10  ;;  %v902_v13 = vstv %s774_s24  ;;  %vm44_vm2 = vcmp.eq.f32.partialorder %v36_v10, inf  ;;  %v47_v46 = vand.u32 2147483648, %v36_v10 }
   0xf   :  { %v905_v15 = vsub.f32 1.0, %v902_v13  ;;  %vm46_vm3 = vcmp.eq.f32.partialorder %v36_v10, 0.0  ;;  %vm443_vm6 = vcmp.eq.f32.partialorder %v902_v13, inf  ;;  %vm445_vm7 = vcmp.eq.f32.partialorder %v902_v13, 0.0 }
  0x10   :  { %793 = vset.pattern.permute.xlu0 %v855_v3  ;;  %813 = vrsqrt.f32 %v49_v11  ;;  %vm57_vm0 = vcmp.eq.f32.partialorder %v49_v11, inf  ;;  %vm59_vm1 = vcmp.eq.f32.partialorder %v49_v11, 0.0  ;;  %v60_v39 = vand.u32 2147483648, %v49_v11 }
  0x11   :  { %797 = vset.pattern.permute.xlu2 %v854_v2  ;;  %795 = vset.pattern.permute.xlu1 %v856_v5  ;;  %815 = vrsqrt.f32 %v36_v10  ;;  %vm456_vm4 = vcmp.eq.f32.partialorder %v905_v15, inf  ;;  %v459_v61 = vand.u32 2147483648, %v905_v15  ;;  %vm458_vm5 = vcmp.eq.f32.partialorder %v905_v15, 0.0 }
  0x12   :  { %85 = vperm.xlu0 %793, %v32_v0   ;;  %126 = vperm.xlu1 %795, %v32_v0   ;;  %817 = vrsqrt.f32 %v905_v15 }
  0x13   :  { %93 = vperm.xlu2 %797, %v30_v4   ;;  %819 = vrsqrt.f32 %v902_v13 }
  0x16   :  { %v814_v14 = vpop.eup %813 }
  0x17   :  { %v51_v16 = vmul.f32 %v814_v14, %v49_v11  ;;  %v816_v17 = vpop.eup %815 }
  0x18   :  { %v38_v18 = vmul.f32 %v816_v17, %v36_v10  ;;  %v818_v23 = vpop.eup %817 }
  0x19   :  { %v52_v19 = vmul.f32 %v814_v14, %v51_v16  ;;  %v450_v26 = vmul.f32 %v818_v23, %v905_v15  ;;  %v820_v27 = vpop.eup %819 }
  0x1a   :  { %122 = vperm.xlu1 %795, %v31_v1   ;;  %75 = vperm.xlu0 %793, %v30_v4   ;;  %v39_v21 = vmul.f32 %v816_v17, %v38_v18  ;;  %v437_v31 = vmul.f32 %v820_v27, %v902_v13 }
  0x1b   :  { %798 = vset.pattern.permute.xlu2 %v857_v6  ;;  %v53_v22 = vmul.f32 0.5, %v52_v19  ;;  %v451_v32 = vmul.f32 %v818_v23, %v450_v26 }
  0x1c   :  { %151 = vperm.xlu2 %798, %v32_v0   ;;  %v40_v24 = vmul.f32 0.5, %v39_v21  ;;  %v438_v36 = vmul.f32 %v820_v27, %v437_v31 }
  0x1d   :  { %v54_v25 = vsub.f32 1.5, %v53_v22  ;;  %v452_v37 = vmul.f32 0.5, %v451_v32 }
  0x1e   :  { %v41_v29 = vsub.f32 1.5, %v40_v24  ;;  %v439_v42 = vmul.f32 0.5, %v438_v36 }
  0x1f   :  { %v55_v30 = vmul.f32 %v814_v14, %v54_v25  ;;  %v453_v43 = vsub.f32 1.5, %v452_v37 }
  0x20   :  { %v42_v34 = vmul.f32 %v816_v17, %v41_v29  ;;  %v440_v49 = vsub.f32 1.5, %v439_v42 }
  0x21   :  { %v56_v35 = vmul.f32 %v55_v30, %v49_v11  ;;  %v454_v50 = vmul.f32 %v818_v23, %v453_v43 }
  0x22   :  { %799 = vset.pattern.permute.xlu1 %v854_v2  ;;  %801 = vset.pattern.permute.xlu0 %v857_v6  ;;  %v43_v40 = vmul.f32 %v42_v34, %v36_v10  ;;  %v441_v56 = vmul.f32 %v820_v27, %v440_v49 }
  0x23   :  { %147 = vperm.xlu0 %801, %v31_v1   ;;  %89 = vperm.xlu1 %799, %v29_v7   ;;  %v58_v41 = vsel %vm57_vm0, %v49_v11, %v56_v35  ;;  %v455_v57 = vmul.f32 %v454_v50, %v905_v15  ;;  %v974_v11 = vld [vmem:[%s1176_s1 + $0x8] sm:$0xf] }
  0x24   :  { %800 = vset.pattern.permute.xlu2 %v856_v5  ;;  %v926_v47 = vsel %vm59_vm1, %v60_v39, %v58_v41  ;;  %v45_v48 = vsel %vm44_vm2, %v36_v10, %v43_v40  ;;  %v442_v62 = vmul.f32 %v441_v56, %v902_v13 }
  0x25   :  { %118 = vperm.xlu2 %800, %v30_v4   ;;  %v63_v53 = vmul.f32 %v926_v47, %v924_v45  ;;  %v937_v55 = vsel %vm46_vm3, %v47_v46, %v45_v48  ;;  %v457_v63 = vsel %vm456_vm4, %v905_v15, %v455_v57 }
  0x26   :  { %v62_v59 = vmul.f32 %v937_v55, %v935_v54  ;;  %821 = vrcp.f32 %v937_v55  ;;  %vm396_vm9 = vweird.f32 %v937_v55 }
  0x27   :  { %v65_v60 = vrot.slane %v63_v53, 4 }
  0x29   :  { %v952_v2 = vadd.f32 %v65_v60, %v62_v59 }
  0x2b   :  { %806 = vset.pattern.permute.xlu0 %v858_v8  ;;  %802 = vset.pattern.permute.xlu1 %v858_v8  ;;  %v988_v21 = vperm.slane %v952_v2, 2  ;;  %v1004_v34 = vperm.slane %v952_v2, 3 }
  0x2c   :  { %172 = vperm.xlu0 %806, %v31_v1   ;;  %176 = vperm.xlu1 %802, %v32_v0  }
  0x2d   :  { %803 = vset.pattern.permute.xlu2 %v855_v3  ;;  %v957_v3 = vld [vmem:[%s1176_s1 + $0x8] sm:$0xf0] }
  0x2e   :  { %70 = vperm.xlu2 %803, %v29_v7  }
  0x34   :  { %804 = vset.pattern.permute.xlu1 %v856_v5  ;;  %164 = vperm.xlu0 %806, %v29_v7   ;;  %v960_v5 = vsel %vm458_vm5, %v459_v61, %v457_v63 }
  0x35   :  { %114 = vperm.xlu1 %804, %v29_v7  }
  0x36   :  { %805 = vset.pattern.permute.xlu2 %v857_v6  ;;  %v444_v6 = vsel %vm443_vm6, %v902_v13, %v442_v62 }
  0x37   :  { %143 = vperm.xlu2 %805, %v30_v4  }
  0x3d   :  { %807 = vset.pattern.permute.xlu1 %v859_v9 }
  0x3e   :  { %480 = vperm.xlu1 %807, %v32_v0  }
  0x3f   :  { %139 = vperm.xlu2 %805, %v29_v7  }
  0x46   :  { %808 = vset.pattern.permute.xlu1 %v858_v8  ;;  %v462_v8 = vmul.f32 %v960_v5, %v957_v3 }
  0x47   :  { %809 = vset.pattern.permute.xlu2 %v859_v9  ;;  %168 = vperm.xlu1 %808, %v30_v4  }
  0x48   :  { %476 = vperm.xlu2 %809, %v31_v1   ;;  %v464_v17 = vrot.slane %v462_v8, 4 }
  0x4f   :  { %810 = vset.pattern.permute.xlu1 %v859_v9 }
  0x50   :  { %468 = vperm.xlu2 %809, %v29_v7   ;;  %472 = vperm.xlu1 %810, %v30_v4   ;;  %v446_v4 = vand.u32 2147483648, %v902_v13  ;;  %v965_v7 = vperm.slane %v952_v2, 0  ;;  %v981_v13 = vperm.slane %v952_v2, 1 }
  0x52   :  { %v976_v14 = vsel %vm445_vm7, %v446_v4, %v444_v6 }
  0x53   :  { %v461_v16 = vmul.f32 %v976_v14, %v974_v11  ;;  %823 = vrcp.f32 %v976_v14  ;;  %vm719_vm14 = vweird.f32 %v976_v14 }
  0x55   :  { %v994_v25 = vadd.f32 %v464_v17, %v461_v16 }
  0x57   :  { %v1007_v35 = vperm.slane %v994_v25, 0  ;;  %v1017_v49 = vperm.slane %v994_v25, 1  ;;  %v1020_v57 = vperm.slane %v994_v25, 2  ;;  %v1037_v8 = vperm.slane %v994_v25, 3 }
  0x63   :  { %v900_v12 = vpop.permute.xlu2 %80 }
  0x6d   :  { %v908_v20 = vpop.permute.xlu2 %93 }
  0x76   :  { %v912_v28 = vpop.permute.xlu2 %151 }
  0x77   :  { %v158_v29 = vmul.f32 %v988_v21, %v912_v28 }
  0x7a   :  { %v915_v33 = vpop.permute.xlu0 %101 }
  0x7b   :  { %v917_v38 = vpop.permute.xlu1 %97  ;;  %v108_v15 = vmul.f32 %v965_v7, %v915_v33 }
  0x7c   :  { %v107_v22 = vmul.f32 %v965_v7, %v917_v38  ;;  %v486_v43 = vmul.f32 %v1007_v35, %v917_v38 }
  0x7e   :  { %v111_v30 = vadd.f32 %v107_v22, %v900_v12 }
  0x7f   :  { %v919_v44 = vpop.permute.xlu2 %118 }
  0x84   :  { %v86_v51 = vpop.permute.xlu0 %85  ;;  %v928_v52 = vpop.permute.xlu1 %126 }
  0x85   :  { %v112_v23 = vadd.f32 %v108_v15, %v86_v51  ;;  %v133_v24 = vmul.f32 %v981_v13, %v928_v52 }
  0x87   :  { %v137_v31 = vadd.f32 %v133_v24, %v112_v23 }
  0x88   :  { %v941_v58 = vpop.permute.xlu2 %70 }
  0x89   :  { %v162_v42 = vadd.f32 %v158_v29, %v137_v31 }
  0x8c   :  { %v123_v0 = vpop.permute.xlu1 %122  ;;  %v950_v1 = vpop.permute.xlu0 %75 }
  0x8d   :  { %v132_v26 = vmul.f32 %v981_v13, %v123_v0  ;;  %v495_v59 = vmul.f32 %v1017_v49, %v123_v0 }
  0x8f   :  { %v136_v36 = vadd.f32 %v132_v26, %v111_v30 }
  0x91   :  { %v969_v10 = vpop.permute.xlu2 %143 }
  0x95   :  { %v148_v18 = vpop.permute.xlu0 %147  ;;  %v985_v19 = vpop.permute.xlu1 %89 }
  0x96   :  { %v157_v32 = vmul.f32 %v988_v21, %v148_v18  ;;  %v105_v60 = vmul.f32 %v965_v7, %v985_v19  ;;  %v504_v62 = vmul.f32 %v1020_v57, %v148_v18 }
  0x98   :  { %v161_v40 = vadd.f32 %v157_v32, %v136_v36  ;;  %v109_v0 = vadd.f32 %v105_v60, %v941_v58  ;;  %v131_v60 = vmul.f32 %v981_v13, %v919_v44 }
  0x99   :  { %v997_v27 = vpop.permute.xlu2 %139 }
  0x9a   :  { %v155_v17 = vmul.f32 %v988_v21, %v997_v27 }
  0x9e   :  { %v173_v37 = vpop.permute.xlu0 %172  ;;  %v1009_v39 = vpop.permute.xlu1 %176 }
  0x9f   :  { %v182_v41 = vmul.f32 %v1004_v34, %v173_v37  ;;  %v183_v12 = vmul.f32 %v1004_v34, %v1009_v39  ;;  %v513_v22 = vmul.f32 %v1037_v8, %v173_v37 }
  0xa1   :  { %v186_v46 = vadd.f32 %v182_v41, %v161_v40  ;;  %v187_v48 = vadd.f32 %v183_v12, %v162_v42  ;;  %v487_v40 = vmul.f32 %v1007_v35, %v915_v33  ;;  %v28_v42 = vld [vmem:[%s1177_s2] sm:$0xf]  ;;  %v484_v33 = vmul.f32 %v1007_v35, %v985_v19 }
  0xa2   :  { %v477_v50 = vpop.permute.xlu2 %476 }
  0xa3   :  { %v190_v51 = vmax.f32 %v186_v46, 0.0  ;;  %v191_v53 = vmax.f32 %v187_v48, 0.0  ;;  %v490_v56 = vadd.f32 %v486_v43, %v477_v50  ;;  %v106_v43 = vmul.f32 %v965_v7, %v908_v20 }
  0xa4   :  { %v496_v46 = vmul.f32 %v1017_v49, %v928_v52  ;;  %v156_v52 = vmul.f32 %v988_v21, %v969_v10 }
  0xa5   :  { %v1025_v61 = vand.u32 4294901760, %v190_v51  ;;  %v1027_v38 = vand.u32 4294901760, %v191_v53  ;;  %v499_v63 = vadd.f32 %v495_v59, %v490_v56  ;;  %v198_v56 = vsel %vm197_vm8, %v28_v42, 0 }
  0xa6   :  { %v165_v26 = vpop.permute.xlu0 %164  ;;  %v505_v59 = vmul.f32 %v1020_v57, %v912_v28  ;;  %v110_v7 = vadd.f32 %v106_v43, %v950_v1  ;;  %v502_v1 = vmul.f32 %v1020_v57, %v997_v27 }
  0xa7   :  { %213 = vmatpush.msra.mxu0 %v1027_v38  ;;  %313 = vmatpush.msra.mxu3 %v1027_v38  ;;  %v115_v4 = vpop.permute.xlu1 %114  ;;  %v1033_v6 = vsub.f32 %v191_v53, %v1027_v38  ;;  %v1041_v16 = vsub.f32 %v190_v51, %v1025_v61  ;;  %v508_v58 = vadd.f32 %v504_v62, %v499_v63 }
  0xa8   :  { %v130_v15 = vmul.f32 %v981_v13, %v115_v4  ;;  %v180_v37 = vmul.f32 %v1004_v34, %v165_v26  ;;  %v493_v28 = vmul.f32 %v1017_v49, %v115_v4  ;;  %v511_v27 = vmul.f32 %v1037_v8, %v165_v26 }
  0xa9   :  { %215 = vmatpush.msra.mxu0 %v1025_v61  ;;  %284 = vmatpush.msra.mxu2 %v1033_v6  ;;  %v243_v18 = vand.u32 4294901760, %v1033_v6  ;;  %v249_v24 = vand.u32 4294901760, %v1041_v16  ;;  %v517_v32 = vadd.f32 %v513_v22, %v508_v58  ;;  %v135_v58 = vadd.f32 %v131_v60, %v110_v7 }
  0xaa   :  { %v134_v23 = vadd.f32 %v130_v15, %v109_v0  ;;  %315 = vmatpush.msra.mxu3 %v1025_v61  ;;  %v469_v48 = vpop.permute.xlu2 %468  ;;  %v514_v0 = vmul.f32 %v1037_v8, %v1009_v39  ;;  %v1079_v15 = vand.u32 4294901760, %v198_v56  ;;  %v485_v26 = vmul.f32 %v1007_v35, %v908_v20 }
  0xab   :  { %287 = vmatpush.msra.mxu2 %v1041_v16  ;;  %v244_v29 = vsub.f32 %v1033_v6, %v243_v18  ;;  %v250_v30 = vsub.f32 %v1041_v16, %v249_v24  ;;  %v521_v51 = vmax.f32 %v517_v32, 0.0  ;;  %v488_v63 = vadd.f32 %v484_v33, %v469_v48 }
  0xac   :  { %v159_v36 = vadd.f32 %v155_v17, %v134_v23  ;;  %v860_v23 = vmov 32   ;;  %v160_v21 = vadd.f32 %v156_v52, %v135_v58  ;;  %v1093_v4 = vsub.f32 %v198_v56, %v1079_v15 }
  0xad   :  { %v245_v31 = vand.u32 4294901760, %v244_v29  ;;  %v251_v41 = vand.u32 4294901760, %v250_v30  ;;  %v1081_v17 = vand.u32 4294901760, %v521_v51  ;;  %811 = vset.pattern.permute.xlu0 %v860_v23  ;;  %v497_v29 = vadd.f32 %v493_v28, %v488_v63 }
  0xae   :  { %v184_v53 = vadd.f32 %v180_v37, %v159_v36  ;;  %194 = vperm.xlu0 %811, %v28_v42   ;;  %v503_v52 = vmul.f32 %v1020_v57, %v969_v10 }
  0xaf   :  { %246 = vmatpush.msra.mxu1 %v245_v31  ;;  %v1090_v36 = vsub.f32 %v521_v51, %v1081_v17 }
  0xb0   :  { %v481_v12 = vpop.permute.xlu1 %480  ;;  %v188_v22 = vmax.f32 %v184_v53, 0.0 }
  0xb1   :  { %v491_v50 = vadd.f32 %v487_v40, %v481_v12  ;;  %252 = vmatpush.msra.mxu1 %v251_v41  ;;  %v506_v40 = vadd.f32 %v502_v1, %v497_v29 }
  0xb2   :  { %v1086_v31 = vand.u32 4294901760, %v188_v22 }
  0xb3   :  { %v500_v62 = vadd.f32 %v496_v46, %v491_v50  ;;  %v1104_v46 = vand.u32 4294901760, %v1093_v4  ;;  %v515_v50 = vadd.f32 %v511_v27, %v506_v40 }
  0xb4   :  { %v260_v43 = vsub.f32 %v188_v22, %v1086_v31 }
  0xb5   :  { %v509_v19 = vadd.f32 %v505_v59, %v500_v62  ;;  %v223_v7 = vsub.f32 %v1093_v4, %v1104_v46  ;;  %v519_v20 = vmax.f32 %v515_v50, 0.0  ;;  %v386_v50 = vrot.slane %v924_v45, 4 }
  0xb6   :  { %812 = vset.pattern.permute.xlu0 %v859_v9  ;;  %v261_v60 = vand.u32 4294901760, %v260_v43  ;;  %v494_v9 = vmul.f32 %v1017_v49, %v919_v44 }
  0xb7   :  { %v518_v13 = vadd.f32 %v514_v0, %v509_v19  ;;  %v224_v49 = vand.u32 4294901760, %v223_v7  ;;  %v541_v10 = vand.u32 4294901760, %v519_v20 }
  0xb8   :  { %v262_v28 = vsub.f32 %v260_v43, %v261_v60 }
  0xb9   :  { %v522_v30 = vmax.f32 %v518_v13, 0.0  ;;  %v169_v39 = vpop.permute.xlu1 %168 }
  0xba   :  { %v181_v32 = vmul.f32 %v1004_v34, %v169_v39  ;;  %v572_v34 = vand.u32 4294901760, %v1090_v36  ;;  %v512_v22 = vmul.f32 %v1037_v8, %v169_v39  ;;  %v583_v8 = vsub.f32 %v519_v20, %v541_v10 }
  0xbb   :  { %v1095_v37 = vand.u32 4294901760, %v522_v30 }
  0xbc   :  { %v185_v41 = vadd.f32 %v181_v32, %v160_v21  ;;  %v573_v59 = vsub.f32 %v1090_v36, %v572_v34  ;;  %v584_v23 = vand.u32 4294901760, %v583_v8 }
  0xbd   :  { %v1099_v42 = vsub.f32 %v522_v30, %v1095_v37  ;;  %v822_v30 = vpop.eup %821 }
  0xbe   :  { %v189_v12 = vmax.f32 %v185_v41, 0.0  ;;  %v574_v19 = vand.u32 4294901760, %v573_v59  ;;  %vm397_vm10 = vweird.f32 %v822_v30 }
  0xbf   :  { %v566_v48 = vand.u32 4294901760, %v1099_v42  ;;  %vm398_vm11 = vmor %vm396_vm9, %vm397_vm10 }
  0xc0   :  { %v216_v33 = vand.u32 4294901760, %v189_v12 }
  0xc1   :  { %v567_v51 = vsub.f32 %v1099_v42, %v566_v48 }
  0xc2   :  { %217 = vmatpush.msra.mxu0 %v216_v33  ;;  %317 = vmatpush.msra.mxu3 %v216_v33  ;;  %v473_v53 = vpop.permute.xlu1 %472  ;;  %v254_v56 = vsub.f32 %v189_v12, %v216_v33  ;;  %v402_v12 = vand.u32 2147483648, %v937_v55 }
  0xc3   :  { %v489_v62 = vadd.f32 %v485_v26, %v473_v53  ;;  %v568_v63 = vand.u32 4294901760, %v567_v51 }
  0xc4   :  { %219 = vmatpush.msra.mxu0 %v1086_v31  ;;  %290 = vmatpush.msra.mxu2 %v254_v56  ;;  %v255_v35 = vand.u32 4294901760, %v254_v56  ;;  %v403_v51 = vor.u32 1.1754944e-38, %v402_v12 }
  0xc5   :  { %v498_v0 = vadd.f32 %v494_v9, %v489_v62  ;;  %319 = vmatpush.msra.mxu3 %v1086_v31  ;;  %225 = vmatmul.f32.vlgmr.msra.gmra.mxu0 %v224_v49 }
  0xc6   :  { %342 = vmatpush.msrb.mxu0 %v243_v18  ;;  %293 = vmatpush.msra.mxu2 %v260_v43  ;;  %v256_v44 = vsub.f32 %v254_v56, %v255_v35  ;;  %v263_v18 = vand.u32 4294901760, %v262_v28 }
  0xc7   :  { %569 = vmatpush.msrb.mxu3 %v568_v63  ;;  %v507_v58 = vadd.f32 %v503_v52, %v498_v0  ;;  %296 = vmatmul.f32.vlgmr.msra.gmra.mxu2 %v1093_v4 }
  0xc8   :  { %346 = vmatpush.msrb.mxu0 %v249_v24  ;;  %536 = vmatpush.msrb.mxu2 %v1095_v37  ;;  %v257_v57 = vand.u32 4294901760, %v256_v44 }
  0xc9   :  { %575 = vmatpush.msrb.mxu3 %v574_v19  ;;  %v516_v6 = vadd.f32 %v512_v22, %v507_v58 }
  0xca   :  { %350 = vmatpush.msrb.mxu0 %v255_v35  ;;  %538 = vmatpush.msrb.mxu2 %v1081_v17 }
  0xcb   :  { %258 = vmatpush.msra.mxu1 %v257_v57  ;;  %v520_v13 = vmax.f32 %v516_v6, 0.0  ;;  %323 = vmatmul.f32.vlgmr.msra.gmra.mxu3 %v1104_v46  ;;  %v725_v57 = vand.u32 2147483648, %v976_v14 }
  0xcc   :  { %354 = vmatpush.msrb.mxu0 %v261_v60 }
  0xcd   :  { %264 = vmatpush.msra.mxu1 %v263_v18  ;;  %v539_v16 = vand.u32 4294901760, %v520_v13  ;;  %356 = vmatmul.f32.vlgmr.msrb.gmra.mxu0 %v1079_v15 }
  0xce   :  { %607 = vmatpush.msra.mxu0 %v1099_v42  ;;  %266 = vmatmul.f32.vlgmr.msra.gmra.mxu1 %v1079_v15 }
  0xcf   :  { %373 = vmatpush.msrb.mxu1 %v1027_v38  ;;  %540 = vmatpush.msrb.mxu2 %v539_v16  ;;  %v577_v24 = vsub.f32 %v520_v13, %v539_v16  ;;  %v585_v38 = vsub.f32 %v583_v8, %v584_v23 }
  0xd0   :  { %610 = vmatpush.msra.mxu0 %v1090_v36 }
  0xd1   :  { %375 = vmatpush.msrb.mxu1 %v1025_v61  ;;  %542 = vmatpush.msrb.mxu2 %v541_v10  ;;  %v578_v1 = vand.u32 4294901760, %v577_v24  ;;  %v586_v21 = vand.u32 4294901760, %v585_v38 }
  0xd2   :  { %613 = vmatpush.msra.mxu0 %v577_v24  ;;  %548 = vmatmul.f32.vlgmr.msrb.gmra.mxu2 %v224_v49 }
  0xd3   :  { %377 = vmatpush.msrb.mxu1 %v216_v33  ;;  %665 = vmatpush.msra.mxu2 %v566_v48  ;;  %v579_v29 = vsub.f32 %v577_v24, %v578_v1  ;;  %v824_v33 = vpop.eup %823  ;;  %v726_v24 = vor.u32 1.1754944e-38, %v725_v57 }
  0xd4   :  { %616 = vmatpush.msra.mxu0 %v583_v8  ;;  %v715_v7 = vmul.f32 %v824_v33, %v976_v14  ;;  %vm720_vm15 = vweird.f32 %v824_v33  ;;  %v709_v8 = vrot.slane %v957_v3, 4 }
  0xd5   :  { %379 = vmatpush.msrb.mxu1 %v1086_v31  ;;  %669 = vmatpush.msra.mxu2 %v572_v34  ;;  %v580_v61 = vand.u32 4294901760, %v579_v29  ;;  %v392_v31 = vmul.f32 %v822_v30, %v937_v55  ;;  %v400_v34 = vand.u32 2147483647, %v937_v55  ;;  %vm721_vm0 = vmor %vm719_vm14, %vm720_vm15 }
  0xd6   :  { %381 = vmatmul.f32.vlgmr.msrb.gmra.mxu1 %v1079_v15  ;;  %619 = vmatmul.f32.vlgmr.msra.gmra.mxu0 %v1093_v4  ;;  %v716_v35 = vsub.f32 1.0, %v715_v7 }
  0xd7   :  { %636 = vmatpush.msra.mxu1 %v1095_v37  ;;  %673 = vmatpush.msra.mxu2 %v578_v1  ;;  %v393_v40 = vsub.f32 1.0, %v392_v31  ;;  %vm401_vm12 = vcmp.eq.f32.partialorder %v400_v34, 8.507059e+37 }
  0xd8   :  { %581 = vmatpush.msrb.mxu3 %v580_v61  ;;  %v717_v28 = vmul.f32 %v824_v33, %v716_v35 }
  0xd9   :  { %638 = vmatpush.msra.mxu1 %v1081_v17  ;;  %677 = vmatpush.msra.mxu2 %v584_v23  ;;  %v394_v41 = vmul.f32 %v822_v30, %v393_v40 }
  0xda   :  { %587 = vmatpush.msrb.mxu3 %v586_v21  ;;  %679 = vmatmul.f32.vlgmr.msra.gmra.mxu2 %v1079_v15  ;;  %v718_v18 = vadd.f32 %v824_v33, %v717_v28 }
  0xdb   :  { %640 = vmatpush.msra.mxu1 %v539_v16  ;;  %589 = vmatmul.f32.vlgmr.msrb.gmra.mxu3 %v1079_v15  ;;  %v395_v43 = vadd.f32 %v822_v30, %v394_v41 }
  0xdc   :  { %696 = vmatpush.msra.mxu3 %v1095_v37  ;;  %v722_v1 = vsel %vm721_vm0, %v824_v33, %v718_v18 }
  0xdd   :  { %642 = vmatpush.msra.mxu1 %v541_v10  ;;  %v399_v56 = vsel %vm398_vm11, %v822_v30, %v395_v43 }
  0xde   :  { %698 = vmatpush.msra.mxu3 %v1081_v17  ;;  %646 = vmatmul.f32.vlgmr.msra.gmra.mxu1 %v1104_v46  ;;  %v404_v9 = vsel %vm401_vm12, %v403_v51, %v399_v56 }
  0xe0   :  { %700 = vmatpush.msra.mxu3 %v539_v16 }
  0xe2   :  { %702 = vmatpush.msra.mxu3 %v541_v10 }
  0xe3   :  { %704 = vmatmul.f32.vlgmr.msra.gmra.mxu3 %v1079_v15 }
 0x120   :  { %v195_v39 = vpop.permute.xlu0 %194 }
 0x142   :  { %v226_v32 = vpop.f32.mrf.mxu0 }
 0x143   :  { %v227_v36 = vadd.f32 %v226_v32, %v195_v39 }
 0x14a   :  { %v297_v27 = vpop.f32.mrf.mxu2  ;;  %v357_v46 = vpop.f32.mrf.mxu0 }
 0x14b   :  { %v267_v37 = vpop.f32.mrf.mxu1 }
 0x14c   :  { %v268_v4 = vadd.f32 %v267_v37, %v227_v36 }
 0x14e   :  { %v298_v17 = vadd.f32 %v297_v27, %v268_v4  ;;  %v324_v42 = vpop.f32.mrf.mxu3 }
 0x150   :  { %v325_v15 = vadd.f32 %v324_v42, %v298_v17 }
 0x152   :  { %v358_v48 = vadd.f32 %v357_v46, %v325_v15 }
 0x153   :  { %v382_v26 = vpop.f32.mrf.mxu1  ;;  %v620_v44 = vpop.f32.mrf.mxu0 }
 0x154   :  { %v383_v53 = vadd.f32 %v382_v26, %v358_v48 }
 0x155   :  { %v549_v63 = vpop.f32.mrf.mxu2 }
 0x156   :  { %v388_v59 = vsub.f32 %v383_v53, %v386_v50  ;;  %v389_v60 = vmul.f32 %v383_v53, %v926_v47  ;;  %v550_v52 = vadd.f32 %v549_v63, %v195_v39 }
 0x158   :  { %v390_v55 = vsub.f32 %v952_v2, %v389_v60  ;;  %v407_v62 = vmul.f32 %v388_v59, %v388_v59 }
 0x15a   :  { %v409_v20 = vsel %vm408_vm13, %v407_v62, 0.0  ;;  %v405_v45 = vmul.f32 %v404_v9, %v390_v55 }
 0x15b   :  { %410 = vadd.xlane.f32.xlu1 %v409_v20  ;;  %v647_v22 = vpop.f32.mrf.mxu1 }
 0x15c   :  { %v406_v0 = vsub.f32 %v405_v45, %v935_v54  ;;  %v723_v54 = vand.u32 2147483647, %v976_v14 }
 0x15d   :  { %v680_v2 = vpop.f32.mrf.mxu2 }
 0x15e   :  { %v590_v19 = vpop.f32.mrf.mxu3  ;;  %v420_v47 = vmul.f32 %v406_v0, %v406_v0  ;;  %vm724_vm1 = vcmp.eq.f32.partialorder %v723_v54, 8.507059e+37 }
 0x15f   :  { %v591_v49 = vadd.f32 %v590_v19, %v550_v52  ;;  %v727_v61 = vsel %vm724_vm1, %v726_v24, %v722_v1 }
 0x160   :  { %v421_v10 = vsel %vm408_vm13, %v420_v47, 0.0 }
 0x161   :  { %v621_v58 = vadd.f32 %v620_v44, %v591_v49  ;;  %422 = vadd.xlane.f32.xlu2 %v421_v10 }
 0x163   :  { %v648_v6 = vadd.f32 %v647_v22, %v621_v58 }
 0x165   :  { %v681_v13 = vadd.f32 %v680_v2, %v648_v6 }
 0x166   :  { %v705_v16 = vpop.f32.mrf.mxu3 }
 0x167   :  { %v706_v23 = vadd.f32 %v705_v16, %v681_v13 }
 0x169   :  { %v711_v29 = vsub.f32 %v706_v23, %v709_v8  ;;  %v712_v38 = vmul.f32 %v706_v23, %v960_v5 }
 0x16b   :  { %v713_v21 = vsub.f32 %v994_v25, %v712_v38  ;;  %v730_v30 = vmul.f32 %v711_v29, %v711_v29 }
 0x16d   :  { %v731_v39 = vsel %vm408_vm13, %v730_v30, 0.0  ;;  %v728_v31 = vmul.f32 %v727_v61, %v713_v21 }
 0x16e   :  { %732 = vadd.xlane.f32.xlu0 %v731_v39 }
 0x16f   :  { %v729_v14 = vsub.f32 %v728_v31, %v974_v11 }
 0x171   :  { %v742_v32 = vmul.f32 %v729_v14, %v729_v14 }
 0x173   :  { %v743_v3 = vsel %vm408_vm13, %v742_v32, 0.0 }
 0x174   :  { %744 = vadd.xlane.f32.xlu2 %v743_v3 }
 0x1ce   :  { %v411_v36 = vpop.xlane.xlu1 %410 }
 0x1cf   :  { %v412_v40 = vrot.slane %v411_v36, 4 }
 0x1d1   :  { %v413_v37 = vadd.f32 %v412_v40, %v411_v36 }
 0x1d3   :  { %v414_v27 = vrot.slane %v413_v37, 2 }
 0x1d4   :  { %v423_v4 = vpop.xlane.xlu2 %422 }
 0x1d5   :  { %v424_v5 = vrot.slane %v423_v4, 4  ;;  %v415_v41 = vadd.f32 %v414_v27, %v413_v37 }
 0x1d7   :  { %v425_v17 = vadd.f32 %v424_v5, %v423_v4  ;;  %v416_v25 = vrot.slane %v415_v41, 1 }
 0x1d9   :  { %v426_v42 = vrot.slane %v425_v17, 2  ;;  %v417_v15 = vadd.f32 %v416_v25, %v415_v41 }
 0x1db   :  { %775 = vpush %v417_v15  ;;  %v427_v12 = vadd.f32 %v426_v42, %v425_v17 }
 0x1dd   :  { %v428_v43 = vrot.slane %v427_v12, 1 }
 0x1df   :  { %v429_v34 = vadd.f32 %v428_v43, %v427_v12 }
 0x1e1   :  { %v733_v11 = vpop.xlane.xlu0 %732  ;;  %777 = vpush %v429_v34 }
 0x1e2   :  { %v734_v46 = vrot.slane %v733_v11, 4 }
 0x1e4   :  { %v735_v48 = vadd.f32 %v734_v46, %v733_v11 }
 0x1e6   :  { %v736_v50 = vrot.slane %v735_v48, 2 }
 0x1e7   :  { %v745_v33 = vpop.xlane.xlu2 %744 }
 0x1e8   :  { %v737_v26 = vadd.f32 %v736_v50, %v735_v48  ;;  %v746_v51 = vrot.slane %v745_v33, 4 }
 0x1ea   :  { %v747_v53 = vadd.f32 %v746_v51, %v745_v33  ;;  %v738_v56 = vrot.slane %v737_v26, 1 }
 0x1ec   :  { %v748_v59 = vrot.slane %v747_v53, 2  ;;  %v739_v60 = vadd.f32 %v738_v56, %v737_v26 }
 0x1ee   :  { %v749_v7 = vadd.f32 %v748_v59, %v747_v53  ;;  %779 = vpush %v739_v60 }
 0x1f0   :  { %v750_v9 = vrot.slane %v749_v7, 1 }
 0x1f2   :  { %v751_v55 = vadd.f32 %v750_v9, %v749_v7 }
 0x1f4   :  { %781 = vpush %v751_v55 }
 0x20c   :  { %s776_s2 = spop %775 }
 0x212   :  { %s778_s7 = spop %777 }
 0x21f   :  { %s780_s8 = spop %779 }
 0x220   :  { %s741_s9 = sadd.f32 %s780_s8, %s776_s2 }
 0x222   :  { %755 = sst [smem:[#allocation5]] %s741_s9 }
 0x225   :  { %s782_s13 = spop %781 }
 0x226   :  { %s753_s14 = sadd.f32 %s782_s13, %s778_s7 }
 0x228   :  { %757 = sst [smem:[#allocation5 + $0x1]] %s753_s14 }
 0x229   :  { %766 = dma.smem_to_vmem %s861_s15, 16, %s764_s12, [#allocation4]  }
 0x22a   :  { %851 = dma.done.wait [#allocation4], 16  }
 0x22b   :  { %852 = vsyncadd [#allocation4], 4294967280 }
 0x22c   :  { %771 = sfence }
 0x22d   :  { %772 = vsyncpa [#allocation3], 1 }
 0x22e   :  { %773 = vsyncpa [#allocation4], 1 }

</bundles_post_ra>
